<compile_context>
chip_gen: v7x
topology: tpu7x:2x2x1
jax: 0.10.0
libtpu: 0.0.40
codegen_flags: <defaults>
</compile_context>

<pallas_src>
import functools

import jax
import jax.numpy as jnp
from jax import lax
from jax.experimental import pallas as pl
from jax.experimental.pallas import tpu as pltpu

# --- deterministic "cfg" stand-ins (module __init__ constants) ---------------
NORMAL_LOSS = 1.0          # cfg.normal_mae_mse_loss
MSE_WEIGHT = 1.0
MAE_WEIGHT = 1.0
# cfg.HKO.EVALUATION.BALANCING_WEIGHTS, cfg.in_len/out_len/epoch are stored in
# __init__ but unused by forward(), so they are not needed here.

_LANES = 128
_SUBLANES = 8
_MAX_TILE_ROWS = 1024      # (1024, 128) f32 tile = 512 KiB per input block
_NUM_SHARDS = 2            # leading "parallel" axis -> 2 TensorCores on v7x


def _round_up(x, m):
    return ((x + m - 1) // m) * m


def _wmse_mae_kernel(t_ref, p_ref, sq_ref, ab_ref, acc_sq, acc_ab, *,
                     tile_rows, blocks_per_shard, valid_rows, needs_mask):
    c = pl.program_id(0)          # shard axis (parallel)
    i = pl.program_id(1)          # reduction axis (arbitrary)

    @pl.when(i == 0)
    def _():
        acc_sq[...] = jnp.zeros_like(acc_sq)
        acc_ab[...] = jnp.zeros_like(acc_ab)

    d = t_ref[...].astype(jnp.float32) - p_ref[...].astype(jnp.float32)

    if needs_mask:
        # Zero rows past the end of the real data (ragged last block and
        # redundant clamped blocks of the last shard).
        block_idx = c * blocks_per_shard + i
        row_start = block_idx * tile_rows
        row_ids = row_start + lax.broadcasted_iota(jnp.int32, d.shape, 0)
        d = jnp.where(row_ids < valid_rows, d, 0.0)

    # Fold the (tile_rows, 128) tile into (8, 128) vector accumulators with
    # pure VPU adds; the cross-lane reduction is deferred to the wrapper.
    acc_sq[...] += jnp.sum((d * d).reshape(-1, _SUBLANES, _LANES), axis=0)
    acc_ab[...] += jnp.sum(jnp.abs(d).reshape(-1, _SUBLANES, _LANES), axis=0)

    @pl.when(i == pl.num_programs(1) - 1)
    def _():
        sq_ref[0] = acc_sq[...]
        ab_ref[0] = acc_ab[...]


def _partial_sums(t2, p2, rows):
    """Returns (sum of squared diffs, sum of abs diffs) over (rows, 128)."""
    tile_rows = min(_MAX_TILE_ROWS, rows)              # rows is a multiple of 8
    num_blocks = -(-rows // tile_rows)
    num_shards = _NUM_SHARDS if num_blocks > 1 else 1
    blocks_per_shard = -(-num_blocks // num_shards)
    needs_mask = (rows % tile_rows != 0) or (blocks_per_shard * num_shards != num_blocks)

    def in_map(c, i):
        # Clamp so redundant tail blocks of the last shard never DMA OOB;
        # their contribution is zeroed by the in-kernel mask.
        return (jnp.minimum(c * blocks_per_shard + i, num_blocks - 1), 0)

    kernel = functools.partial(
        _wmse_mae_kernel,
        tile_rows=tile_rows,
        blocks_per_shard=blocks_per_shard,
        valid_rows=rows,
        needs_mask=needs_mask,
    )

    out_shape = jax.ShapeDtypeStruct((num_shards, _SUBLANES, _LANES), jnp.float32)
    sq, ab = pl.pallas_call(
        kernel,
        out_shape=(out_shape, out_shape),
        grid_spec=pltpu.PrefetchScalarGridSpec(
            num_scalar_prefetch=0,
            grid=(num_shards, blocks_per_shard),
            in_specs=[
                pl.BlockSpec((tile_rows, _LANES), in_map),
                pl.BlockSpec((tile_rows, _LANES), in_map),
            ],
            out_specs=(
                pl.BlockSpec((1, _SUBLANES, _LANES), lambda c, i: (c, 0, 0)),
                pl.BlockSpec((1, _SUBLANES, _LANES), lambda c, i: (c, 0, 0)),
            ),
            scratch_shapes=[
                pltpu.VMEM((_SUBLANES, _LANES), jnp.float32),
                pltpu.VMEM((_SUBLANES, _LANES), jnp.float32),
            ],
        ),
        compiler_params=pltpu.CompilerParams(
            dimension_semantics=("parallel", "arbitrary"),
        ),
    )(t2, p2)
    # Single cheap cross-lane reduction of the per-shard per-lane partials.
    return jnp.sum(sq), jnp.sum(ab)


@functools.partial(jax.jit, static_argnames=("mse_weight", "mae_weight",
                                             "normal_loss"))
def weighted_mse_mae(truth, pred, epoch,
                     mse_weight=MSE_WEIGHT,
                     mae_weight=MAE_WEIGHT,
                     normal_loss=NORMAL_LOSS):
    del epoch  # unused by the PyTorch forward()
    assert truth.shape == pred.shape and truth.ndim == 5
    S, B = truth.shape[0], truth.shape[1]

    n = truth.size
    flat_t = truth.reshape(-1)          # free reshapes; native dtype streamed
    flat_p = pred.reshape(-1)
    padded = _round_up(n, _SUBLANES * _LANES)
    if padded != n:
        # Only copies when numel is not a multiple of 1024; identical zero
        # padding of truth and pred contributes 0 to both sums.
        flat_t = jnp.pad(flat_t, (0, padded - n))
        flat_p = jnp.pad(flat_p, (0, padded - n))
    rows = padded // _LANES             # multiple of 8
    t2 = flat_t.reshape(rows, _LANES)
    p2 = flat_p.reshape(rows, _LANES)

    sum_sq, sum_ab = _partial_sums(t2, p2, rows)

    denom = jnp.float32(S * B)          # mean over (S,B) of per-(S,B) sums
    mse = mse_weight * (sum_sq / denom)
    mae = mae_weight * (sum_ab / denom)
    return normal_loss * (mse + mae)


def _reference(truth, pred):
    d = truth.astype(jnp.float32) - pred.astype(jnp.float32)
    mse = jnp.sum(d ** 2, axis=(2, 3, 4))
    mae = jnp.sum(jnp.abs(d), axis=(2, 3, 4))
    return NORMAL_LOSS * (MSE_WEIGHT * jnp.mean(mse) + MAE_WEIGHT * jnp.mean(mae))


if __name__ == "__main__":
    key = jax.random.PRNGKey(0)
    epoch = 3

    # (seq, batch, channel, H, W) cases exercising: exact-fit path, padded /
    # ragged / sharded path, and multi-block-per-shard accumulation path.
    shapes = [
        (8, 2, 1, 16, 16),
        (10, 4, 1, 60, 60),
        (8, 4, 1, 96, 96),
    ]

    for shape in shapes:
        key, k1, k2 = jax.random.split(key, 3)
        truth = jax.random.uniform(k1, shape, dtype=jnp.float32)
        pred = jax.random.uniform(k2, shape, dtype=jnp.float32)

        loss = jax.block_until_ready(weighted_mse_mae(truth, pred, epoch))
        ref = jax.block_until_ready(_reference(truth, pred))
        assert jnp.allclose(loss, ref, rtol=2e-5, atol=1e-5), (shape, loss, ref)

    print("KERNEL_OK")
</pallas_src>

<mosaic_0001>
module attributes {stable_mosaic.version = 11 : i64} {
  func.func @_wmse_mae_kernel(%arg0: i32, %arg1: i32, %arg2: memref<32x128xf32, #tpu.memory_space<vmem>>, %arg3: memref<32x128xf32, #tpu.memory_space<vmem>>, %arg4: memref<1x8x128xf32, #tpu.memory_space<vmem>>, %arg5: memref<1x8x128xf32, #tpu.memory_space<vmem>>, %arg6: memref<8x128xf32, #tpu.memory_space<vmem>>, %arg7: memref<8x128xf32, #tpu.memory_space<vmem>>) attributes {dimension_semantics = [#tpu.dimension_semantics<parallel>, #tpu.dimension_semantics<arbitrary>], iteration_bounds = array<i64: 1, 1>, scalar_prefetch = 0 : i64, scratch_operands = 2 : i64, tpu.core_type = #tpu.core_type<tc>, window_params = [{transform_indices = @transform_0, window_bounds = array<i64: 32, 128>}, {transform_indices = @transform_1, window_bounds = array<i64: 32, 128>}, {transform_indices = @transform_2, window_bounds = array<i64: 1, 8, 128>}, {transform_indices = @transform_3, window_bounds = array<i64: 1, 8, 128>}]} {
    %c0_i32 = arith.constant 0 : i32
    %0 = arith.cmpi eq, %arg1, %c0_i32 : i32
    %1 = arith.extui %0 : i1 to i32
    %c0_i32_0 = arith.constant 0 : i32
    %2 = arith.cmpi ne, %1, %c0_i32_0 : i32
    scf.if %2 {
      %cst_15 = arith.constant 0.000000e+00 : f32
      %21 = vector.broadcast %cst_15 : f32 to vector<8x128xf32>
      %c0_16 = arith.constant 0 : index
      %c0_17 = arith.constant 0 : index
      %22 = vector.load %arg6[%c0_16, %c0_17] : memref<8x128xf32, #tpu.memory_space<vmem>>, vector<8x128xf32>
      tpu.vector_store %arg6[%c0_16, %c0_17], %21 {strides = array<i32>} : memref<8x128xf32, #tpu.memory_space<vmem>>, vector<8x128xf32>,
      %cst_18 = arith.constant 0.000000e+00 : f32
      %23 = vector.broadcast %cst_18 : f32 to vector<8x128xf32>
      %c0_19 = arith.constant 0 : index
      %c0_20 = arith.constant 0 : index
      %24 = vector.load %arg7[%c0_19, %c0_20] : memref<8x128xf32, #tpu.memory_space<vmem>>, vector<8x128xf32>
      tpu.vector_store %arg7[%c0_19, %c0_20], %23 {strides = array<i32>} : memref<8x128xf32, #tpu.memory_space<vmem>>, vector<8x128xf32>,
    } else {
    }
    %c0 = arith.constant 0 : index
    %c0_1 = arith.constant 0 : index
    %3 = vector.load %arg2[%c0, %c0_1] : memref<32x128xf32, #tpu.memory_space<vmem>>, vector<32x128xf32>
    %c0_2 = arith.constant 0 : index
    %c0_3 = arith.constant 0 : index
    %4 = vector.load %arg3[%c0_2, %c0_3] : memref<32x128xf32, #tpu.memory_space<vmem>>, vector<32x128xf32>
    %5 = arith.subf %3, %4 : vector<32x128xf32>
    %c0_4 = arith.constant 0 : index
    %c0_5 = arith.constant 0 : index
    %6 = vector.load %arg6[%c0_4, %c0_5] : memref<8x128xf32, #tpu.memory_space<vmem>>, vector<8x128xf32>
    %7 = arith.mulf %5, %5 : vector<32x128xf32>
    %8 = vector.shape_cast %7 : vector<32x128xf32> to vector<4x8x128xf32>
    %cst = arith.constant dense<0.000000e+00> : vector<8x128xf32>
    %9 = vector.multi_reduction <add>, %8, %cst [0] : vector<4x8x128xf32> to vector<8x128xf32>
    %10 = arith.addf %6, %9 : vector<8x128xf32>
    %c0_6 = arith.constant 0 : index
    %c0_7 = arith.constant 0 : index
    %11 = vector.load %arg6[%c0_6, %c0_7] : memref<8x128xf32, #tpu.memory_space<vmem>>, vector<8x128xf32>
    tpu.vector_store %arg6[%c0_6, %c0_7], %10 {strides = array<i32>} : memref<8x128xf32, #tpu.memory_space<vmem>>, vector<8x128xf32>,
    %c0_8 = arith.constant 0 : index
    %c0_9 = arith.constant 0 : index
    %12 = vector.load %arg7[%c0_8, %c0_9] : memref<8x128xf32, #tpu.memory_space<vmem>>, vector<8x128xf32>
    %13 = math.absf %5 : vector<32x128xf32>
    %14 = vector.shape_cast %13 : vector<32x128xf32> to vector<4x8x128xf32>
    %cst_10 = arith.constant dense<0.000000e+00> : vector<8x128xf32>
    %15 = vector.multi_reduction <add>, %14, %cst_10 [0] : vector<4x8x128xf32> to vector<8x128xf32>
    %16 = arith.addf %12, %15 : vector<8x128xf32>
    %c0_11 = arith.constant 0 : index
    %c0_12 = arith.constant 0 : index
    %17 = vector.load %arg7[%c0_11, %c0_12] : memref<8x128xf32, #tpu.memory_space<vmem>>, vector<8x128xf32>
    tpu.vector_store %arg7[%c0_11, %c0_12], %16 {strides = array<i32>} : memref<8x128xf32, #tpu.memory_space<vmem>>, vector<8x128xf32>,
    %c0_i32_13 = arith.constant 0 : i32
    %18 = arith.cmpi eq, %arg1, %c0_i32_13 : i32
    %19 = arith.extui %18 : i1 to i32
    %c0_i32_14 = arith.constant 0 : i32
    %20 = arith.cmpi ne, %19, %c0_i32_14 : i32
    scf.if %20 {
      %c0_15 = arith.constant 0 : index
      %c0_16 = arith.constant 0 : index
      %21 = vector.load %arg6[%c0_15, %c0_16] : memref<8x128xf32, #tpu.memory_space<vmem>>, vector<8x128xf32>
      %c0_17 = arith.constant 0 : index
      %c0_18 = arith.constant 0 : index
      %c0_19 = arith.constant 0 : index
      %22 = vector.load %arg4[%c0_17, %c0_18, %c0_19] : memref<1x8x128xf32, #tpu.memory_space<vmem>>, vector<1x8x128xf32>
      %23 = vector.shape_cast %22 : vector<1x8x128xf32> to vector<8x128xf32>
      %24 = vector.shape_cast %21 : vector<8x128xf32> to vector<1x8x128xf32>
      tpu.vector_store %arg4[%c0_17, %c0_18, %c0_19], %24 {strides = array<i32>} : memref<1x8x128xf32, #tpu.memory_space<vmem>>, vector<1x8x128xf32>,
      %c0_20 = arith.constant 0 : index
      %c0_21 = arith.constant 0 : index
      %25 = vector.load %arg7[%c0_20, %c0_21] : memref<8x128xf32, #tpu.memory_space<vmem>>, vector<8x128xf32>
      %c0_22 = arith.constant 0 : index
      %c0_23 = arith.constant 0 : index
      %c0_24 = arith.constant 0 : index
      %26 = vector.load %arg5[%c0_22, %c0_23, %c0_24] : memref<1x8x128xf32, #tpu.memory_space<vmem>>, vector<1x8x128xf32>
      %27 = vector.shape_cast %26 : vector<1x8x128xf32> to vector<8x128xf32>
      %28 = vector.shape_cast %25 : vector<8x128xf32> to vector<1x8x128xf32>
      tpu.vector_store %arg5[%c0_22, %c0_23, %c0_24], %28 {strides = array<i32>} : memref<1x8x128xf32, #tpu.memory_space<vmem>>, vector<1x8x128xf32>,
    } else {
    }
    return
  }
  func.func @transform_0(%arg0: i32, %arg1: i32) -> (i32, i32) {
    %c1_i32 = arith.constant 1 : i32
    %0 = arith.muli %arg0, %c1_i32 : i32
    %1 = arith.addi %0, %arg1 : i32
    %c0_i32 = arith.constant 0 : i32
    %2 = arith.minsi %1, %c0_i32 : i32
    %c0_i32_0 = arith.constant 0 : i32
    %c0_i32_1 = arith.constant 0 : i32
    return %2, %c0_i32_0 : i32, i32
  }
  func.func @transform_1(%arg0: i32, %arg1: i32) -> (i32, i32) {
    %c1_i32 = arith.constant 1 : i32
    %0 = arith.muli %arg0, %c1_i32 : i32
    %1 = arith.addi %0, %arg1 : i32
    %c0_i32 = arith.constant 0 : i32
    %2 = arith.minsi %1, %c0_i32 : i32
    %c0_i32_0 = arith.constant 0 : i32
    %c0_i32_1 = arith.constant 0 : i32
    return %2, %c0_i32_0 : i32, i32
  }
  func.func @transform_2(%arg0: i32, %arg1: i32) -> (i32, i32, i32) {
    %c0_i32 = arith.constant 0 : i32
    %c0_i32_0 = arith.constant 0 : i32
    %c0_i32_1 = arith.constant 0 : i32
    return %arg0, %c0_i32, %c0_i32_0 : i32, i32, i32
  }
  func.func @transform_3(%arg0: i32, %arg1: i32) -> (i32, i32, i32) {
    %c0_i32 = arith.constant 0 : i32
    %c0_i32_0 = arith.constant 0 : i32
    %c0_i32_1 = arith.constant 0 : i32
    return %arg0, %c0_i32, %c0_i32_0 : i32, i32, i32
  }
}

</mosaic_0001>

<bundles_post_ra>
// kernel: weighted_mse_mae.1
= control target key start
LH: loop header
LB: loop body
LE: loop exit
PB: predicated region body
PF: predicated region fallthrough
CT: control target
= control target key end

     0   :  { %s192_s0 = inlined_call_operand.vmem [shape: f32[32,128], index: 0, kind: input, shape index: {}]   ;;  %s193_s1 = inlined_call_operand.vmem [shape: f32[32,128], index: 1, kind: input, shape index: {}]   ;;  %s194_s2 = inlined_call_operand.vmem [shape: f32[1,8,128], index: 2, kind: output, shape index: {0}]   ;;  %s195_s3 = inlined_call_operand.vmem [shape: f32[1,8,128], index: 3, kind: output, shape index: {1}]  }
   0x1   :  { %v83_v0 = vld [vmem:[%s192_s0] sm:$0xff]  ;;  %v84_v1 = vld [vmem:[%s192_s0 + $0x8] sm:$0xff]  ;;  %v85_v2 = vld [vmem:[%s192_s0 + $0x10] sm:$0xff] }
   0x2   :  { %v86_v3 = vld [vmem:[%s192_s0 + $0x18] sm:$0xff]  ;;  %v87_v4 = vld [vmem:[%s193_s1] sm:$0xff]  ;;  %v88_v5 = vld [vmem:[%s193_s1 + $0x8] sm:$0xff] }
   0x3   :  { %v89_v6 = vld [vmem:[%s193_s1 + $0x10] sm:$0xff]  ;;  %v90_v7 = vld [vmem:[%s193_s1 + $0x18] sm:$0xff]  ;;  %v91_v8 = vsub.f32 %v83_v0, %v87_v4  ;;  %v92_v9 = vsub.f32 %v84_v1, %v88_v5 }
   0x4   :  { %v93_v10 = vsub.f32 %v85_v2, %v89_v6  ;;  %v94_v11 = vsub.f32 %v86_v3, %v90_v7 }
   0x5   :  { %v96_v12 = vmul.f32 %v91_v8, %v91_v8  ;;  %v97_v13 = vmul.f32 %v92_v9, %v92_v9  ;;  %v106_v14 = vand.u32 2147483647, %v91_v8  ;;  %v107_v15 = vand.u32 2147483647, %v92_v9 }
   0x6   :  { %v98_v16 = vmul.f32 %v93_v10, %v93_v10  ;;  %v108_v17 = vand.u32 2147483647, %v93_v10  ;;  %v99_v18 = vmul.f32 %v94_v11, %v94_v11  ;;  %v109_v20 = vand.u32 2147483647, %v94_v11 }
   0x7   :  { %v100_v19 = vadd.f32 %v97_v13, %v96_v12  ;;  %v110_v21 = vadd.f32 %v107_v15, %v106_v14 }
   0x9   :  { %v101_v22 = vadd.f32 %v100_v19, %v98_v16  ;;  %v111_v23 = vadd.f32 %v110_v21, %v108_v17 }
   0xb   :  { %v102_v24 = vadd.f32 %v101_v22, %v99_v18  ;;  %v112_v25 = vadd.f32 %v111_v23, %v109_v20 }
   0xd   :  { %119 = vst [vmem:[%s194_s2] sm:$0xff] %v102_v24  ;;  %121 = vst [vmem:[%s195_s3] sm:$0xff] %v112_v25 }

</bundles_post_ra>
